<compile_context>
chip_gen: v7x
topology: tpu7x:2x2x1
jax: 0.10.0
libtpu: 0.0.40
codegen_flags: <defaults>
</compile_context>

<pallas_src>
import functools

import jax
import jax.numpy as jnp
from jax import lax
from jax.experimental import pallas as pl
from jax.experimental.pallas import tpu as pltpu


def _round_up(v, m):
    return ((v + m - 1) // m) * m


def _chip_config():
    """Per-generation tile targets and VMEM budget.

    v5e/v6e/v5p have 128 MiB physical VMEM -> big tiles, ~100 MiB cap.
    v7x has 64 MiB per TensorCore -> moderate tiles, conservative ~48 MiB cap
    (leave headroom for Mosaic internal scratch / semaphores).
    Unknown chips fall back to conservative settings.
    """
    kind = ""
    try:
        kind = jax.devices()[0].device_kind.lower()
    except Exception:
        pass
    if "v7" in kind:
        return dict(tm=768, tn=768, tk=2048, vmem_cap=48 << 20)
    if "v6" in kind:
        return dict(tm=1024, tn=1024, tk=2048, vmem_cap=100 << 20)
    if "v5" in kind and ("lite" in kind or "v5e" in kind):
        return dict(tm=512, tn=512, tk=1536, vmem_cap=100 << 20)
    if "v5" in kind:  # v5p
        return dict(tm=1024, tn=1024, tk=2048, vmem_cap=100 << 20)
    return dict(tm=512, tn=512, tk=1024, vmem_cap=64 << 20)


def _pick_tile(dim, target, align):
    """Return (tile, padded_dim).

    tile is an `align`-multiple <= max(target, align) that divides padded_dim
    (= dim rounded up to `align`, or to the tile when dim <= target).  Never
    returns an unbounded full-extent block for large dims, so VMEM stays
    bounded for awkward shapes; padding waste is < align in the large-dim case.
    """
    target = max(target, align)
    if dim <= target:
        t = _round_up(dim, align)
        return t, t
    base = _round_up(dim, align)
    t = (target // align) * align
    while t > align and base % t != 0:
        t -= align
    return t, base


def _vmem_estimate(tm, tn, tk, k_pad, r_pad, x_sz, w_sz, a_sz, out_sz):
    """Rough VMEM footprint (inputs/outputs double-buffered, lane/sublane pad)."""
    f32 = 4
    lane = lambda v: max(_round_up(v, 128), 128)
    sub = lambda v: max(_round_up(v, 8), 8)
    est = 0
    est += 2 * sub(tm) * lane(tk) * x_sz            # x tiles
    est += 2 * sub(tn) * lane(tk) * w_sz            # W tiles
    est += 2 * 8 * lane(tn) * f32                   # bias tiles (f32)
    est += 2 * sub(k_pad) * lane(r_pad) * a_sz      # LoRA A (resident, 2 bufs)
    est += 2 * sub(r_pad) * lane(tn) * f32          # alpha*B tiles (f32)
    est += 2 * sub(tm) * lane(tn) * out_sz          # output tiles
    est += sub(tm) * lane(tn) * f32                 # acc scratch
    est += sub(tm) * lane(r_pad) * f32              # xa scratch
    return est


def _lora_linear_kernel(x_ref, w_ref, bias_ref, a_ref, bm_ref, o_ref,
                        acc_ref, xa_ref, *, tk, xa_per_j):
    """One (i, j, k) grid step of y = x @ W^T + b + (x @ A) @ (alpha*B).

    x_ref   : [tm, tk]       activations tile
    w_ref   : [tn, tk]       weight tile in native [out, in] layout
    bias_ref: [1,  tn]       bias tile (f32)
    a_ref   : [k_pad, r]     full LoRA A, resident in VMEM
    bm_ref  : [r,  tn]       alpha * LoRA B tile (f32)
    o_ref   : [tm, tn]       output tile
    acc_ref : [tm, tn]       f32 base-GEMM accumulator (scratch)
    xa_ref  : [tm, r]        f32 x@A accumulator (scratch)
    """
    j = pl.program_id(1)
    k = pl.program_id(2)
    k_last = pl.num_programs(2) - 1

    x = x_ref[...]

    # Base GEMM: contract x (tm, tk) with W (tn, tk) along K -> (tm, tn).
    base = lax.dot_general(
        x, w_ref[...],
        dimension_numbers=(((1,), (1,)), ((), ())),
        preferred_element_type=jnp.float32)

    # First K step stores (with bias folded in) instead of zero-init + add:
    # saves a full-tile f32 zero store per (i, j) tile and the epilogue add.
    @pl.when(k == 0)
    def _():
        acc_ref[...] = base + bias_ref[...]

    @pl.when(k != 0)
    def _():
        acc_ref[...] += base

    # LoRA left factor xa = x @ A accumulated over K.  A is resident; slice
    # the current K window out of it.
    def _xa_step():
        k_off = pl.multiple_of(k * tk, 128)
        xa_part = jnp.dot(x, a_ref[pl.ds(k_off, tk), :],
                          preferred_element_type=jnp.float32)

        @pl.when(k == 0)
        def _():
            xa_ref[...] = xa_part

        @pl.when(k != 0)
        def _():
            xa_ref[...] += xa_part

    if xa_per_j:
        # Recompute xa for every N tile (cost ~rank/tn extra MXU work) so the
        # j axis can be marked "parallel" (unlocks v7x's 2nd TensorCore when
        # the whole batch is a single M tile).
        _xa_step()
    else:
        # Accumulate xa only once per M row (at j == 0) and reuse it for all
        # later N tiles.  NOTE: this requires the j axis to stay sequential
        # ("arbitrary"); the wrapper enforces that pairing.
        pl.when(j == 0)(_xa_step)

    @pl.when(k == k_last)
    def _():
        # alpha already folded into bm_ref; epilogue in f32, cast at store.
        lora = jnp.dot(xa_ref[...], bm_ref[...],
                       preferred_element_type=jnp.float32)
        o_ref[...] = (acc_ref[...] + lora).astype(o_ref.dtype)


def linear_with_lora(x, w, b, a_mat, b_mat, alpha, *,
                     tile_m=None, tile_n=None, tile_k=None):
    """y = x @ w.T + b + alpha * (x @ a_mat @ b_mat)

    x     : [batch, in_features]
    w     : [out_features, in_features]   (native nn.Linear layout)
    b     : [out_features]
    a_mat : [in_features, rank]
    b_mat : [rank, out_features]
    tile_m/tile_n/tile_k override the per-chip tile-size targets (testing).
    """
    m, kdim = x.shape
    n, k2 = w.shape
    assert k2 == kdim, "weight / activation inner-dim mismatch"
    r = a_mat.shape[1]
    assert a_mat.shape == (kdim, r) and b_mat.shape == (r, n) and b.shape == (n,)

    cfg = _chip_config()
    tgt_m = tile_m if tile_m is not None else cfg["tm"]
    tgt_n = tile_n if tile_n is not None else cfg["tn"]
    tgt_k = tile_k if tile_k is not None else cfg["tk"]

    r_pad = max(_round_up(r, 8), 8)

    x_sz = jnp.dtype(x.dtype).itemsize
    w_sz = jnp.dtype(w.dtype).itemsize
    a_sz = jnp.dtype(a_mat.dtype).itemsize
    out_sz = x_sz

    # Pick tiles; if the double-buffered footprint exceeds the per-gen budget,
    # shrink output (M/N) tiles first and keep K as long as possible.
    budget = int(cfg["vmem_cap"] * 0.85)
    while True:
        tm, m_pad = _pick_tile(m, tgt_m, 8)
        tn, n_pad = _pick_tile(n, tgt_n, 128)
        tk, k_pad = _pick_tile(kdim, tgt_k, 128)
        est = _vmem_estimate(tm, tn, tk, k_pad, r_pad, x_sz, w_sz, a_sz, out_sz)
        if est <= budget or (tgt_m <= 256 and tgt_n <= 256 and tgt_k <= 512):
            break
        if tgt_m > 256:
            tgt_m = max(256, tgt_m // 2)
        elif tgt_n > 256:
            tgt_n = max(256, tgt_n // 2)
        else:
            tgt_k = max(512, tgt_k // 2)

    grid_m, grid_n, grid_k = m_pad // tm, n_pad // tn, k_pad // tk
    grid = (grid_m, grid_n, grid_k)

    # xa handling: single M tile -> recompute xa per N tile and mark j
    # "parallel"; otherwise reuse xa across N tiles and keep j "arbitrary".
    xa_per_j = (grid_m == 1 and grid_n > 1)
    dims = ("parallel", "parallel" if xa_per_j else "arbitrary", "arbitrary")

    # Fold alpha into the tiny (rank, out) B matrix once; keep it and the bias
    # in f32 so the LoRA path isn't re-quantized and epilogue adds are f32.
    bm_scaled = jnp.float32(alpha) * b_mat.astype(jnp.float32)
    bias2d = b.astype(jnp.float32).reshape(1, n)

    # Zero-pad to tile multiples (exact for the math; sliced off at the end).
    def pad2(arr, d0, d1):
        p0, p1 = d0 - arr.shape[0], d1 - arr.shape[1]
        if p0 == 0 and p1 == 0:
            return arr
        return jnp.pad(arr, ((0, p0), (0, p1)))

    x_p = pad2(x, m_pad, k_pad)
    w_p = pad2(w, n_pad, k_pad)
    bias_p = pad2(bias2d, 1, n_pad)
    a_p = pad2(a_mat, k_pad, r_pad)
    bm_p = pad2(bm_scaled, r_pad, n_pad)

    kernel = functools.partial(_lora_linear_kernel, tk=tk, xa_per_j=xa_per_j)

    grid_spec = pltpu.PrefetchScalarGridSpec(
        num_scalar_prefetch=0,
        grid=grid,
        in_specs=[
            pl.BlockSpec((tm, tk), lambda i, j, k: (i, k)),        # x
            pl.BlockSpec((tn, tk), lambda i, j, k: (j, k)),        # W (native)
            pl.BlockSpec((1, tn), lambda i, j, k: (0, j)),         # bias (f32)
            pl.BlockSpec((k_pad, r_pad), lambda i, j, k: (0, 0)),  # LoRA A resident
            pl.BlockSpec((r_pad, tn), lambda i, j, k: (0, j)),     # alpha*B (f32)
        ],
        out_specs=pl.BlockSpec((tm, tn), lambda i, j, k: (i, j)),
        scratch_shapes=[
            pltpu.VMEM((tm, tn), jnp.float32),     # base-GEMM accumulator
            pltpu.VMEM((tm, r_pad), jnp.float32),  # xa = x @ A
        ],
    )

    vmem_limit = int(min(cfg["vmem_cap"],
                         max(est * 1.5 + (4 << 20), 32 << 20)))

    # HBM traffic estimate including re-reads: x is streamed once per N tile,
    # W once per M tile; A is resident (single fetch); bias/alpha*B per M row.
    flops = (2 * m_pad * n_pad * k_pad
             + 2 * m_pad * r_pad * k_pad
             + 2 * m_pad * r_pad * n_pad)
    bytes_accessed = (grid_n * m_pad * k_pad * x_sz
                      + grid_m * n_pad * k_pad * w_sz
                      + grid_m * n_pad * 4
                      + k_pad * r_pad * a_sz
                      + grid_m * r_pad * n_pad * 4
                      + m_pad * n_pad * out_sz)

    out = pl.pallas_call(
        kernel,
        out_shape=jax.ShapeDtypeStruct((m_pad, n_pad), x.dtype),
        grid_spec=grid_spec,
        compiler_params=pltpu.CompilerParams(
            dimension_semantics=dims,
            vmem_limit_bytes=vmem_limit,
        ),
        cost_estimate=pl.CostEstimate(flops=flops, transcendentals=0,
                                      bytes_accessed=bytes_accessed),
    )(x_p, w_p, bias_p, a_p, bm_p)

    if (m_pad, n_pad) != (m, n):
        out = out[:m, :n]
    return out


if __name__ == "__main__":
    # Small shapes; out_features / in_features deliberately not multiples of
    # 128 so the padding path is exercised too.
    batch, in_features, out_features, rank = 32, 384, 320, 8
    alpha = 2.0

    key = jax.random.PRNGKey(0)
    kx, kw, kb, ka, kbm = jax.random.split(key, 5)

    x = jax.random.normal(kx, (batch, in_features), dtype=jnp.float32)
    w = jax.random.normal(kw, (out_features, in_features), dtype=jnp.float32) * 0.02
    b = jax.random.normal(kb, (out_features,), dtype=jnp.float32) * 0.1

    std_dev = 1.0 / jnp.sqrt(jnp.float32(rank))
    a_mat = jax.random.normal(ka, (in_features, rank), dtype=jnp.float32) * std_dev
    # PyTorch inits B to zeros (LoRA path vanishes at init); use nonzero B so
    # the fused LoRA path is actually validated.
    b_mat = jax.random.normal(kbm, (rank, out_features), dtype=jnp.float32) * 0.05

    y_ref = x @ w.T + b + alpha * ((x @ a_mat) @ b_mat)

    # 1) Auto (per-chip) tiles, f32 — single-tile grid on small shapes.
    y = jax.block_until_ready(linear_with_lora(x, w, b, a_mat, b_mat, alpha))
    assert y.shape == (batch, out_features)
    assert jnp.allclose(y, y_ref, atol=5e-3, rtol=5e-3), "f32 (auto tiles) mismatch"

    # 2) Forced small tiles with grid_M == 1: exercises the multi-tile
    #    (N, K) grid, K accumulation, padding, and the per-j xa-recompute
    #    ("parallel" j) path.
    y2 = jax.block_until_ready(linear_with_lora(
        x, w, b, a_mat, b_mat, alpha, tile_m=32, tile_n=128, tile_k=128))
    assert jnp.allclose(y2, y_ref, atol=5e-3, rtol=5e-3), "per-j-mode mismatch"

    # 3) Forced small tiles with grid_M > 1: exercises the xa-reuse-across-N
    #    ("arbitrary" j) path.
    y3 = jax.block_until_ready(linear_with_lora(
        x, w, b, a_mat, b_mat, alpha, tile_m=8, tile_n=128, tile_k=128))
    assert jnp.allclose(y3, y_ref, atol=5e-3, rtol=5e-3), "xa-reuse-mode mismatch"

    # 4) bf16 operands (production path: half the HBM weight bytes, bf16 MXU
    #    feed, f32 accumulation inside the kernel).
    y_bf16 = jax.block_until_ready(linear_with_lora(
        x.astype(jnp.bfloat16), w.astype(jnp.bfloat16), b,
        a_mat.astype(jnp.bfloat16), b_mat.astype(jnp.bfloat16), alpha))
    assert jnp.allclose(y_bf16.astype(jnp.float32), y_ref, atol=0.25, rtol=0.05), \
        "bf16 mismatch vs reference"

    print("KERNEL_OK")
</pallas_src>

<mosaic_0001>
module attributes {stable_mosaic.version = 11 : i64} {
  func.func @_lora_linear_kernel(%arg0: i32, %arg1: i32, %arg2: i32, %arg3: memref<32x384xf32, #tpu.memory_space<vmem>>, %arg4: memref<384x384xf32, #tpu.memory_space<vmem>>, %arg5: memref<1x384xf32, #tpu.memory_space<vmem>>, %arg6: memref<384x8xf32, #tpu.memory_space<vmem>>, %arg7: memref<8x384xf32, #tpu.memory_space<vmem>>, %arg8: memref<32x384xf32, #tpu.memory_space<vmem>>, %arg9: memref<32x384xf32, #tpu.memory_space<vmem>>, %arg10: memref<32x8xf32, #tpu.memory_space<vmem>>) attributes {dimension_semantics = [#tpu.dimension_semantics<parallel>, #tpu.dimension_semantics<arbitrary>, #tpu.dimension_semantics<arbitrary>], iteration_bounds = array<i64: 1, 1, 1>, scalar_prefetch = 0 : i64, scratch_operands = 2 : i64, tpu.core_type = #tpu.core_type<tc>, window_params = [{transform_indices = @transform_0, window_bounds = array<i64: 32, 384>}, {transform_indices = @transform_1, window_bounds = array<i64: 384, 384>}, {transform_indices = @transform_2, window_bounds = array<i64: 1, 384>}, {pipeline_mode = #tpu.pipeline_mode<synchronous>, transform_indices = @transform_3, window_bounds = array<i64: 384, 8>}, {transform_indices = @transform_4, window_bounds = array<i64: 8, 384>}, {transform_indices = @transform_5, window_bounds = array<i64: 32, 384>}]} {
    %c0 = arith.constant 0 : index
    %c0_0 = arith.constant 0 : index
    %0 = vector.load %arg3[%c0, %c0_0] : memref<32x384xf32, #tpu.memory_space<vmem>>, vector<32x384xf32>
    %c0_1 = arith.constant 0 : index
    %c0_2 = arith.constant 0 : index
    %1 = vector.load %arg4[%c0_1, %c0_2] : memref<384x384xf32, #tpu.memory_space<vmem>>, vector<384x384xf32>
    %cst = arith.constant dense<0.000000e+00> : vector<32x384xf32>
    %2 = tpu.matmul %0, %1, %cst {dimension_numbers = #tpu.dot_dimension_numbers<[1], [1], [0], [0], [0, 0, 1, 0], [], []>} : vector<32x384xf32>, vector<384x384xf32>, vector<32x384xf32> -> vector<32x384xf32>
    %c0_i32 = arith.constant 0 : i32
    %3 = arith.cmpi eq, %arg2, %c0_i32 : i32
    %4 = arith.extui %3 : i1 to i32
    %c0_i32_3 = arith.constant 0 : i32
    %5 = arith.cmpi ne, %4, %c0_i32_3 : i32
    scf.if %5 {
      %c0_10 = arith.constant 0 : index
      %c0_11 = arith.constant 0 : index
      %15 = vector.load %arg5[%c0_10, %c0_11] : memref<1x384xf32, #tpu.memory_space<vmem>>, vector<1x384xf32>
      %16 = vector.broadcast %15 : vector<1x384xf32> to vector<32x384xf32>
      %17 = arith.addf %2, %16 : vector<32x384xf32>
      %c0_12 = arith.constant 0 : index
      %c0_13 = arith.constant 0 : index
      %18 = vector.load %arg9[%c0_12, %c0_13] : memref<32x384xf32, #tpu.memory_space<vmem>>, vector<32x384xf32>
      tpu.vector_store %arg9[%c0_12, %c0_13], %17 {strides = array<i32>} : memref<32x384xf32, #tpu.memory_space<vmem>>, vector<32x384xf32>,
    } else {
    }
    %c0_i32_4 = arith.constant 0 : i32
    %6 = arith.cmpi ne, %arg2, %c0_i32_4 : i32
    %7 = arith.extui %6 : i1 to i32
    %c0_i32_5 = arith.constant 0 : i32
    %8 = arith.cmpi ne, %7, %c0_i32_5 : i32
    scf.if %8 {
      %c0_10 = arith.constant 0 : index
      %c0_11 = arith.constant 0 : index
      %15 = vector.load %arg9[%c0_10, %c0_11] : memref<32x384xf32, #tpu.memory_space<vmem>>, vector<32x384xf32>
      %16 = arith.addf %15, %2 : vector<32x384xf32>
      %c0_12 = arith.constant 0 : index
      %c0_13 = arith.constant 0 : index
      %17 = vector.load %arg9[%c0_12, %c0_13] : memref<32x384xf32, #tpu.memory_space<vmem>>, vector<32x384xf32>
      tpu.vector_store %arg9[%c0_12, %c0_13], %16 {strides = array<i32>} : memref<32x384xf32, #tpu.memory_space<vmem>>, vector<32x384xf32>,
    } else {
    }
    %c0_i32_6 = arith.constant 0 : i32
    %9 = arith.cmpi eq, %arg1, %c0_i32_6 : i32
    %10 = arith.extui %9 : i1 to i32
    %c0_i32_7 = arith.constant 0 : i32
    %11 = arith.cmpi ne, %10, %c0_i32_7 : i32
    scf.if %11 {
      %c384_i32 = arith.constant 384 : i32
      %15 = arith.muli %arg2, %c384_i32 : i32
      %16 = tpu.assume_multiple %15, 128 : i32
      %17 = arith.index_cast %16 : i32 to index
      %c0_10 = arith.constant 0 : index
      %18 = vector.load %arg6[%17, %c0_10] : memref<384x8xf32, #tpu.memory_space<vmem>>, vector<384x8xf32>
      %cst_11 = arith.constant dense<0.000000e+00> : vector<32x8xf32>
      %19 = tpu.matmul %0, %18, %cst_11 {dimension_numbers = #tpu.dot_dimension_numbers<[1], [0], [0], [1], [0, 0, 1, 1], [], []>} : vector<32x384xf32>, vector<384x8xf32>, vector<32x8xf32> -> vector<32x8xf32>
      %c0_i32_12 = arith.constant 0 : i32
      %20 = arith.cmpi eq, %arg2, %c0_i32_12 : i32
      %21 = arith.extui %20 : i1 to i32
      %c0_i32_13 = arith.constant 0 : i32
      %22 = arith.cmpi ne, %21, %c0_i32_13 : i32
      scf.if %22 {
        %c0_16 = arith.constant 0 : index
        %c0_17 = arith.constant 0 : index
        %26 = vector.load %arg10[%c0_16, %c0_17] : memref<32x8xf32, #tpu.memory_space<vmem>>, vector<32x8xf32>
        tpu.vector_store %arg10[%c0_16, %c0_17], %19 {strides = array<i32>} : memref<32x8xf32, #tpu.memory_space<vmem>>, vector<32x8xf32>,
      } else {
      }
      %c0_i32_14 = arith.constant 0 : i32
      %23 = arith.cmpi ne, %arg2, %c0_i32_14 : i32
      %24 = arith.extui %23 : i1 to i32
      %c0_i32_15 = arith.constant 0 : i32
      %25 = arith.cmpi ne, %24, %c0_i32_15 : i32
      scf.if %25 {
        %c0_16 = arith.constant 0 : index
        %c0_17 = arith.constant 0 : index
        %26 = vector.load %arg10[%c0_16, %c0_17] : memref<32x8xf32, #tpu.memory_space<vmem>>, vector<32x8xf32>
        %27 = arith.addf %26, %19 : vector<32x8xf32>
        %c0_18 = arith.constant 0 : index
        %c0_19 = arith.constant 0 : index
        %28 = vector.load %arg10[%c0_18, %c0_19] : memref<32x8xf32, #tpu.memory_space<vmem>>, vector<32x8xf32>
        tpu.vector_store %arg10[%c0_18, %c0_19], %27 {strides = array<i32>} : memref<32x8xf32, #tpu.memory_space<vmem>>, vector<32x8xf32>,
      } else {
      }
    } else {
    }
    %c0_i32_8 = arith.constant 0 : i32
    %12 = arith.cmpi eq, %arg2, %c0_i32_8 : i32
    %13 = arith.extui %12 : i1 to i32
    %c0_i32_9 = arith.constant 0 : i32
    %14 = arith.cmpi ne, %13, %c0_i32_9 : i32
    scf.if %14 {
      %c0_10 = arith.constant 0 : index
      %c0_11 = arith.constant 0 : index
      %15 = vector.load %arg10[%c0_10, %c0_11] : memref<32x8xf32, #tpu.memory_space<vmem>>, vector<32x8xf32>
      %c0_12 = arith.constant 0 : index
      %c0_13 = arith.constant 0 : index
      %16 = vector.load %arg7[%c0_12, %c0_13] : memref<8x384xf32, #tpu.memory_space<vmem>>, vector<8x384xf32>
      %cst_14 = arith.constant dense<0.000000e+00> : vector<32x384xf32>
      %17 = tpu.matmul %15, %16, %cst_14 {dimension_numbers = #tpu.dot_dimension_numbers<[1], [0], [0], [1], [0, 0, 1, 1], [], []>} : vector<32x8xf32>, vector<8x384xf32>, vector<32x384xf32> -> vector<32x384xf32>
      %c0_15 = arith.constant 0 : index
      %c0_16 = arith.constant 0 : index
      %18 = vector.load %arg9[%c0_15, %c0_16] : memref<32x384xf32, #tpu.memory_space<vmem>>, vector<32x384xf32>
      %19 = arith.addf %18, %17 : vector<32x384xf32>
      %c0_17 = arith.constant 0 : index
      %c0_18 = arith.constant 0 : index
      %20 = vector.load %arg8[%c0_17, %c0_18] : memref<32x384xf32, #tpu.memory_space<vmem>>, vector<32x384xf32>
      tpu.vector_store %arg8[%c0_17, %c0_18], %19 {strides = array<i32>} : memref<32x384xf32, #tpu.memory_space<vmem>>, vector<32x384xf32>,
    } else {
    }
    return
  }
  func.func @transform_0(%arg0: i32, %arg1: i32, %arg2: i32) -> (i32, i32) {
    %c0_i32 = arith.constant 0 : i32
    return %arg0, %arg2 : i32, i32
  }
  func.func @transform_1(%arg0: i32, %arg1: i32, %arg2: i32) -> (i32, i32) {
    %c0_i32 = arith.constant 0 : i32
    return %arg1, %arg2 : i32, i32
  }
  func.func @transform_2(%arg0: i32, %arg1: i32, %arg2: i32) -> (i32, i32) {
    %c0_i32 = arith.constant 0 : i32
    %c0_i32_0 = arith.constant 0 : i32
    return %c0_i32, %arg1 : i32, i32
  }
  func.func @transform_3(%arg0: i32, %arg1: i32, %arg2: i32) -> (i32, i32) {
    %c0_i32 = arith.constant 0 : i32
    %c0_i32_0 = arith.constant 0 : i32
    %c0_i32_1 = arith.constant 0 : i32
    return %c0_i32, %c0_i32_0 : i32, i32
  }
  func.func @transform_4(%arg0: i32, %arg1: i32, %arg2: i32) -> (i32, i32) {
    %c0_i32 = arith.constant 0 : i32
    %c0_i32_0 = arith.constant 0 : i32
    return %c0_i32, %arg1 : i32, i32
  }
  func.func @transform_5(%arg0: i32, %arg1: i32, %arg2: i32) -> (i32, i32) {
    %c0_i32 = arith.constant 0 : i32
    return %arg0, %arg1 : i32, i32
  }
}

</mosaic_0001>

<bundles_post_ra>
// kernel: tpu_custom_call.1
= control target key start
LH: loop header
LB: loop body
LE: loop exit
PB: predicated region body
PF: predicated region fallthrough
CT: control target
= control target key end

     0   :  { %10 = vsyncpa [#allocation5], 0  ;;  %s1991_s0 = inlined_call_operand.vmem [shape: f32[32,384], index: 0, kind: input, shape index: {}]   ;;  %s1992_s1 = inlined_call_operand.hbm [shape: f32[384,384], index: 1, kind: input, shape index: {}]   ;;  %s1993_s2 = inlined_call_operand.vmem [shape: f32[1,384], index: 2, kind: input, shape index: {}]   ;;  %s1994_s3 = inlined_call_operand.vmem [shape: f32[384,8], index: 3, kind: input, shape index: {}]   ;;  %s1995_s4 = inlined_call_operand.vmem [shape: f32[8,384], index: 4, kind: input, shape index: {}]   ;;  %s1996_s5 = inlined_call_operand.hbm [shape: f32[32,384], index: 5, kind: output, shape index: {}]  }
   0x1   :  { %11 = vsyncpa [#allocation6], 0  ;;  %s1646_s18 = smov [#allocation4]   ;;  %s1598_s22 = scalar_lea.hbm %s1992_s1, 18432 }
   0x2   :  { %s19_s19 = sshll.u32 %s1646_s18, 4  ;;  %p1599_p0 = scmp.ne.s32.totalorder %s1992_s1, %s1598_s22  ;;  %s20_s19 = int_to_ptr.vmem [resolvable:$true] %s19_s19 }
   0x3   :  { %p1602_p1 = scmp.lt.u32.totalorder %s1598_s22, %s1992_s1 }
   0x5   :  { %p1604_p2 = pnand %p1602_p1, %p1599_p0 }
   0x7   :  { %1607 = shalt.err (!%p1604_p2)
}
   0x8   :  { %s1608_s27 = scalar_lea.vmem %s20_s19, 18432  ;;  %p1613_p4 = scmp.lt.s32.totalorder %s20_s19, %s20_s19 }
   0x9   :  { %p1609_p3 = scmp.ne.s32.totalorder %s20_s19, %s1608_s27  ;;  %p1614_p5 = scmp.lt.s32.totalorder %s1608_s27, %s1608_s27 }
   0xb   :  { %p1615_p6 = por %p1614_p5, %p1613_p4 }
   0xd   :  { %p1616_p7 = pnand %p1615_p6, %p1609_p3 }
   0xf   :  { %1619 = shalt.err (!%p1616_p7)
}
  0x10   :  { %s1647_s28 = smov 384   ;;  %s1648_s29 = smov 24  }
  0x11   :  { %25 = dma.hbm_to_vmem [thread:$0]  %s1992_s1, 18432, %s20_s19, [#allocation5], %s1647_s28, %s1647_s28, %s1648_s29  }
  0x12   :  { %1642 = dma.done.wait [#allocation5], 18432  }
  0x13   :  { %1643 = vsyncadd [#allocation5], 4294948864  ;;  %v144_v0 = vld [vmem:[#allocation4 + $0x308] sm:$0xff]  ;;  %v147_v1 = vld [vmem:[#allocation4 + $0x320] sm:$0xff]  ;;  %vm851_vm0 = vcmask 64512  }
  0x14   :  { %v143_v2 = vld [vmem:[#allocation4 + $0x300] sm:$0xff]  ;;  %v1439_v3 = vpack.c.bf16 %v147_v1, %v144_v0  ;;  %v146_v4 = vld [vmem:[#allocation4 + $0x318] sm:$0xff]  ;;  %v153_v6 = vld [vmem:[#allocation4 + $0x350] sm:$0xff] }
  0x15   :  { %v150_v5 = vld [vmem:[#allocation4 + $0x338] sm:$0xff]  ;;  %v1441_v7 = vpack.c.bf16 %v146_v4, %v143_v2  ;;  %v149_v9 = vld [vmem:[#allocation4 + $0x330] sm:$0xff]  ;;  %v152_v10 = vld [vmem:[#allocation4 + $0x348] sm:$0xff] }
  0x16   :  { %v1443_v8 = vpack.c.bf16 %v153_v6, %v150_v5  ;;  %1440 = vmatprep.subr.bf16.mxu1 %v1439_v3  ;;  %v156_v11 = vld [vmem:[#allocation4 + $0x368] sm:$0xff]  ;;  %v159_v12 = vld [vmem:[#allocation4 + $0x380] sm:$0xff]  ;;  %v1445_v13 = vpack.c.bf16 %v152_v10, %v149_v9  ;;  %v158_v17 = vld [vmem:[#allocation4 + $0x378] sm:$0xff] }
  0x17   :  { %1442 = vmatpush1.bf16.xpose.msra.mxu1 %v1441_v7  ;;  %v1447_v14 = vpack.c.bf16 %v159_v12, %v156_v11  ;;  %v1699_v15 = vld [vmem:[%s1991_s0 + $0x8] sm:$0xff]  ;;  %v155_v16 = vld [vmem:[#allocation4 + $0x360] sm:$0xff]  ;;  %v162_v18 = vld [vmem:[#allocation4 + $0x398] sm:$0xff] }
  0x18   :  { %1444 = vmatprep.subr.bf16.mxu1 %v1443_v8  ;;  %433 = vmatprep.mubr.f32.mxu1 %v1699_v15  ;;  %v165_v19 = vld [vmem:[#allocation4 + $0x3b0] sm:$0xff]  ;;  %v1449_v20 = vpack.c.bf16 %v158_v17, %v155_v16  ;;  %v164_v23 = vld [vmem:[#allocation4 + $0x3a8] sm:$0xff]  ;;  %v171_v25 = vld [vmem:[#allocation4 + $0x3e0] sm:$0xff] }
  0x19   :  { %255 = vmatprep.mubr.f32.mxu0 %v1699_v15  ;;  %v1451_v21 = vpack.c.bf16 %v165_v19, %v162_v18  ;;  %v161_v22 = vld [vmem:[#allocation4 + $0x390] sm:$0xff]  ;;  %v168_v24 = vld [vmem:[#allocation4 + $0x3c8] sm:$0xff]  ;;  %v167_v28 = vld [vmem:[#allocation4 + $0x3c0] sm:$0xff] }
  0x1a   :  { %v1453_v26 = vpack.c.bf16 %v164_v23, %v161_v22  ;;  %v1455_v27 = vpack.c.bf16 %v171_v25, %v168_v24  ;;  %v170_v29 = vld [vmem:[#allocation4 + $0x3d8] sm:$0xff]  ;;  %v177_v31 = vld [vmem:[#allocation4 + $0x410] sm:$0xff]  ;;  %v176_v35 = vld [vmem:[#allocation4 + $0x408] sm:$0xff] }
  0x1b   :  { %v174_v30 = vld [vmem:[#allocation4 + $0x3f8] sm:$0xff]  ;;  %v1457_v32 = vpack.c.bf16 %v170_v29, %v167_v28  ;;  %v173_v34 = vld [vmem:[#allocation4 + $0x3f0] sm:$0xff]  ;;  %v180_v36 = vld [vmem:[#allocation4 + $0x428] sm:$0xff] }
  0x1c   :  { %v1459_v33 = vpack.c.bf16 %v177_v31, %v174_v30  ;;  %v183_v37 = vld [vmem:[#allocation4 + $0x440] sm:$0xff]  ;;  %v1461_v38 = vpack.c.bf16 %v176_v35, %v173_v34  ;;  %v182_v41 = vld [vmem:[#allocation4 + $0x438] sm:$0xff]  ;;  %v189_v43 = vld [vmem:[#allocation4 + $0x470] sm:$0xff] }
  0x1d   :  { %v1463_v39 = vpack.c.bf16 %v183_v37, %v180_v36  ;;  %v179_v40 = vld [vmem:[#allocation4 + $0x420] sm:$0xff]  ;;  %v186_v42 = vld [vmem:[#allocation4 + $0x458] sm:$0xff]  ;;  %v185_v46 = vld [vmem:[#allocation4 + $0x450] sm:$0xff] }
  0x1e   :  { %v1465_v44 = vpack.c.bf16 %v182_v41, %v179_v40  ;;  %v1467_v45 = vpack.c.bf16 %v189_v43, %v186_v42  ;;  %v188_v47 = vld [vmem:[#allocation4 + $0x468] sm:$0xff]  ;;  %v145_v48 = vld [vmem:[#allocation4 + $0x310] sm:$0xff]  ;;  %v151_v52 = vld [vmem:[#allocation4 + $0x340] sm:$0xff] }
  0x1f   :  { %1446 = vmatpush1.bf16.xpose.msra.mxu1 %v1445_v13  ;;  %v148_v49 = vld [vmem:[#allocation4 + $0x328] sm:$0xff]  ;;  %v1469_v50 = vpack.c.bf16 %v188_v47, %v185_v46  ;;  %v154_v53 = vld [vmem:[#allocation4 + $0x358] sm:$0xff]  ;;  %v1706_v54 = vld [vmem:[%s1991_s0] sm:$0xff] }
  0x20   :  { %1448 = vmatprep.subr.bf16.mxu1 %v1447_v14  ;;  %v1471_v51 = vpack.c.bf16 %v148_v49, %v145_v48  ;;  %v1475_v55 = vpack.c.bf16 %v154_v53, %v151_v52  ;;  %v1711_v56 = vld [vmem:[%s1991_s0 + $0x20] sm:$0xff]  ;;  %v1718_v57 = vld [vmem:[%s1991_s0 + $0x18] sm:$0xff]  ;;  %v157_v59 = vld [vmem:[#allocation4 + $0x370] sm:$0xff] }
  0x21   :  { %v1723_v58 = vld [vmem:[%s1991_s0 + $0x38] sm:$0xff]  ;;  %v160_v60 = vld [vmem:[#allocation4 + $0x388] sm:$0xff]  ;;  %v1728_v61 = vld [vmem:[%s1991_s0 + $0x30] sm:$0xff] }
  0x22   :  { %v48_v62 = vld [vmem:[#allocation4 + $0x8] sm:$0xff]  ;;  %v51_v63 = vld [vmem:[#allocation4 + $0x20] sm:$0xff]  ;;  %v50_v2 = vld [vmem:[#allocation4 + $0x18] sm:$0xff]  ;;  %v1479_v5 = vpack.c.bf16 %v160_v60, %v157_v59 }
  0x23   :  { %v47_v0 = vld [vmem:[#allocation4] sm:$0xff]  ;;  %v1343_v1 = vpack.c.bf16 %v51_v63, %v48_v62  ;;  %v54_v3 = vld [vmem:[#allocation4 + $0x38] sm:$0xff]  ;;  %v57_v4 = vld [vmem:[#allocation4 + $0x50] sm:$0xff] }
  0x24   :  { %v1735_v6 = vld [vmem:[%s1991_s0 + $0x50] sm:$0xff]  ;;  %v1345_v7 = vpack.c.bf16 %v50_v2, %v47_v0  ;;  %v1347_v8 = vpack.c.bf16 %v57_v4, %v54_v3  ;;  %v1742_v9 = vld [vmem:[%s1991_s0 + $0x48] sm:$0xff]  ;;  %v63_v14 = vld [vmem:[#allocation4 + $0x80] sm:$0xff] }
  0x25   :  { %1344 = vmatprep.subr.bf16.mxu0 %v1343_v1  ;;  %v53_v10 = vld [vmem:[#allocation4 + $0x30] sm:$0xff]  ;;  %v56_v11 = vld [vmem:[#allocation4 + $0x48] sm:$0xff]  ;;  %v163_v16 = vld [vmem:[#allocation4 + $0x3a0] sm:$0xff] }
  0x26   :  { %1346 = vmatpush1.bf16.xpose.msra.mxu0 %v1345_v7  ;;  %v1747_v12 = vld [vmem:[%s1991_s0 + $0x10] sm:$0xff]  ;;  %v60_v13 = vld [vmem:[#allocation4 + $0x68] sm:$0xff]  ;;  %v166_v17 = vld [vmem:[#allocation4 + $0x3b8] sm:$0xff]  ;;  %v1349_v18 = vpack.c.bf16 %v56_v11, %v53_v10 }
  0x27   :  { %1450 = vmatpush1.bf16.xpose.msra.mxu1 %v1449_v20  ;;  %1348 = vmatprep.subr.bf16.mxu0 %v1347_v8  ;;  %v1351_v19 = vpack.c.bf16 %v63_v14, %v60_v13  ;;  %v1483_v20 = vpack.c.bf16 %v166_v17, %v163_v16  ;;  %v62_v22 = vld [vmem:[#allocation4 + $0x78] sm:$0xff]  ;;  %v69_v24 = vld [vmem:[#allocation4 + $0xb0] sm:$0xff]  ;;  %v68_v31 = vld [vmem:[#allocation4 + $0xa8] sm:$0xff] }
  0x28   :  { %1452 = vmatprep.subr.bf16.mxu1 %v1451_v21  ;;  %v59_v21 = vld [vmem:[#allocation4 + $0x60] sm:$0xff]  ;;  %v66_v23 = vld [vmem:[#allocation4 + $0x98] sm:$0xff]  ;;  %v169_v25 = vld [vmem:[#allocation4 + $0x3d0] sm:$0xff] }
  0x29   :  { %v1355_v28 = vpack.c.bf16 %v69_v24, %v66_v23  ;;  %v65_v30 = vld [vmem:[#allocation4 + $0x90] sm:$0xff]  ;;  %v175_v34 = vld [vmem:[#allocation4 + $0x400] sm:$0xff]  ;;  %v178_v35 = vld [vmem:[#allocation4 + $0x418] sm:$0xff] }
  0x2a   :  { %v1357_v36 = vpack.c.bf16 %v68_v31, %v65_v30  ;;  %v74_v40 = vld [vmem:[#allocation4 + $0xd8] sm:$0xff]  ;;  %v81_v42 = vld [vmem:[#allocation4 + $0x110] sm:$0xff]  ;;  %v80_v49 = vld [vmem:[#allocation4 + $0x108] sm:$0xff] }
  0x2b   :  { %v78_v41 = vld [vmem:[#allocation4 + $0xf8] sm:$0xff]  ;;  %v181_v43 = vld [vmem:[#allocation4 + $0x430] sm:$0xff]  ;;  %v187_v52 = vld [vmem:[#allocation4 + $0x460] sm:$0xff] }
  0x2c   :  { %v1363_v46 = vpack.c.bf16 %v81_v42, %v78_v41  ;;  %v77_v48 = vld [vmem:[#allocation4 + $0xf0] sm:$0xff]  ;;  %v190_v53 = vld [vmem:[#allocation4 + $0x478] sm:$0xff]  ;;  %v83_v62 = vld [vmem:[#allocation4 + $0x120] sm:$0xff] }
  0x2d   :  { %v1499_v60 = vpack.c.bf16 %v190_v53, %v187_v52  ;;  %v86_v63 = vld [vmem:[#allocation4 + $0x138] sm:$0xff]  ;;  %v93_v1 = vld [vmem:[#allocation4 + $0x170] sm:$0xff]  ;;  %v646_v2 = vld [vmem:[%s1994_s3 + $0x80] sm:$0xff] }
  0x2e   :  { %1350 = vmatpush1.bf16.xpose.msra.mxu0 %v1349_v18  ;;  %v90_v0 = vld [vmem:[#allocation4 + $0x158] sm:$0xff]  ;;  %v647_v3 = vld [vmem:[%s1994_s3 + $0x88] sm:$0xff]  ;;  %v1369_v4 = vpack.c.bf16 %v86_v63, %v83_v62  ;;  %v89_v8 = vld [vmem:[#allocation4 + $0x150] sm:$0xff] }
  0x2f   :  { %1454 = vmatpush1.bf16.xpose.msra.mxu1 %v1453_v26  ;;  %1352 = vmatprep.subr.bf16.mxu0 %v1351_v19  ;;  %v172_v26 = vld [vmem:[#allocation4 + $0x3e8] sm:$0xff]  ;;  %v1503_v7 = vpack.c.bf16 %v647_v3, %v646_v2  ;;  %v630_v11 = vld [vmem:[%s1994_s3] sm:$0xff]  ;;  %v648_v14 = vld [vmem:[%s1994_s3 + $0x90] sm:$0xff] }
  0x30   :  { %1456 = vmatprep.subr.bf16.mxu1 %v1455_v27  ;;  %v1353_v27 = vpack.c.bf16 %v62_v22, %v59_v21  ;;  %v1487_v29 = vpack.c.bf16 %v172_v26, %v169_v25  ;;  %v92_v10 = vld [vmem:[#allocation4 + $0x168] sm:$0xff]  ;;  %v649_v16 = vld [vmem:[%s1994_s3 + $0x98] sm:$0xff]  ;;  %v99_v18 = vld [vmem:[#allocation4 + $0x1a0] sm:$0xff] }
  0x31   :  { %v631_v13 = vld [vmem:[%s1994_s3 + $0x8] sm:$0xff]  ;;  %v1373_v19 = vpack.c.bf16 %v92_v10, %v89_v8  ;;  %v1777_v22 = vld [vmem:[%s1991_s0 + $0x40] sm:$0xff]  ;;  %v1507_v23 = vpack.c.bf16 %v649_v16, %v648_v14  ;;  %v632_v24 = vld [vmem:[%s1994_s3 + $0x10] sm:$0xff] }
  0x32   :  { %v96_v17 = vld [vmem:[#allocation4 + $0x188] sm:$0xff]  ;;  %v1505_v21 = vpack.c.bf16 %v631_v13, %v630_v11  ;;  %v633_v25 = vld [vmem:[%s1994_s3 + $0x18] sm:$0xff]  ;;  %v634_v31 = vld [vmem:[%s1994_s3 + $0x20] sm:$0xff] }
  0x33   :  { %v1375_v26 = vpack.c.bf16 %v99_v18, %v96_v17  ;;  %v1509_v30 = vpack.c.bf16 %v633_v25, %v632_v24  ;;  %v639_v52 = vld [vmem:[%s1994_s3 + $0x48] sm:$0xff]  ;;  %v656_v53 = vld [vmem:[%s1994_s3 + $0xd0] sm:$0xff]  ;;  %v661_v10 = vld [vmem:[%s1994_s3 + $0xf8] sm:$0xff] }
  0x34   :  { %v640_v63 = vld [vmem:[%s1994_s3 + $0x50] sm:$0xff]  ;;  %v659_v2 = vld [vmem:[%s1994_s3 + $0xe8] sm:$0xff]  ;;  %v111_v13 = vld [vmem:[#allocation4 + $0x200] sm:$0xff] }
  0x35   :  { %v660_v8 = vld [vmem:[%s1994_s3 + $0xf0] sm:$0xff]  ;;  %v108_v11 = vld [vmem:[#allocation4 + $0x1e8] sm:$0xff]  ;;  %v107_v14 = vld [vmem:[#allocation4 + $0x1e0] sm:$0xff] }
  0x36   :  { %1354 = vmatpush1.bf16.xpose.msra.mxu0 %v1353_v27  ;;  %v650_v27 = vld [vmem:[%s1994_s3 + $0xa0] sm:$0xff]  ;;  %v1383_v17 = vpack.c.bf16 %v111_v13, %v108_v11  ;;  %v110_v18 = vld [vmem:[#allocation4 + $0x1f8] sm:$0xff]  ;;  %v644_v24 = vld [vmem:[%s1994_s3 + $0x70] sm:$0xff] }
  0x37   :  { %1458 = vmatpush1.bf16.xpose.msra.mxu1 %v1457_v32  ;;  %1356 = vmatprep.subr.bf16.mxu0 %v1355_v28  ;;  %v72_v32 = vld [vmem:[#allocation4 + $0xc8] sm:$0xff]  ;;  %v645_v25 = vld [vmem:[%s1994_s3 + $0x78] sm:$0xff] }
  0x38   :  { %1460 = vmatprep.subr.bf16.mxu1 %v1459_v33  ;;  %v75_v33 = vld [vmem:[#allocation4 + $0xe0] sm:$0xff]  ;;  %v651_v28 = vld [vmem:[%s1994_s3 + $0xa8] sm:$0xff]  ;;  %v134_v11 = vld [vmem:[#allocation4 + $0x2b8] sm:$0xff] }
  0x39   :  { %v1359_v37 = vpack.c.bf16 %v75_v33, %v72_v32  ;;  %v95_v32 = vld [vmem:[#allocation4 + $0x180] sm:$0xff]  ;;  %v98_v33 = vld [vmem:[#allocation4 + $0x198] sm:$0xff] }
  0x3e   :  { %1358 = vmatpush1.bf16.xpose.msra.mxu0 %v1357_v36  ;;  %v102_v36 = vld [vmem:[#allocation4 + $0x1b8] sm:$0xff] }
  0x3f   :  { %1462 = vmatpush1.bf16.xpose.msra.mxu1 %v1461_v38  ;;  %v1491_v38 = vpack.c.bf16 %v178_v35, %v175_v34  ;;  %1360 = vmatprep.subr.bf16.mxu0 %v1359_v37  ;;  %v1511_v34 = vpack.c.bf16 %v651_v28, %v650_v27  ;;  %v635_v35 = vld [vmem:[%s1994_s3 + $0x28] sm:$0xff]  ;;  %v105_v37 = vld [vmem:[#allocation4 + $0x1d0] sm:$0xff]  ;;  %v662_v28 = vld [vmem:[%s1994_s3 + $0x100] sm:$0xff] }
  0x40   :  { %1464 = vmatprep.subr.bf16.mxu1 %v1463_v39  ;;  %v71_v39 = vld [vmem:[#allocation4 + $0xc0] sm:$0xff]  ;;  %v1513_v41 = vpack.c.bf16 %v635_v35, %v634_v31  ;;  %v1379_v42 = vpack.c.bf16 %v105_v37, %v102_v36  ;;  %v1533_v31 = vpack.c.bf16 %v645_v25, %v644_v24  ;;  %v664_v35 = vld [vmem:[%s1994_s3 + $0x110] sm:$0xff]  ;;  %v665_v36 = vld [vmem:[%s1994_s3 + $0x118] sm:$0xff] }
  0x41   :  { %v120_v37 = vld [vmem:[#allocation4 + $0x248] sm:$0xff]  ;;  %v137_v24 = vld [vmem:[#allocation4 + $0x2d0] sm:$0xff] }
  0x42   :  { %v140_v25 = vld [vmem:[#allocation4 + $0x2e8] sm:$0xff] }
  0x47   :  { %1466 = vmatpush1.bf16.xpose.msra.mxu1 %v1465_v44  ;;  %v184_v44 = vld [vmem:[#allocation4 + $0x448] sm:$0xff] }
  0x48   :  { %1468 = vmatprep.subr.bf16.mxu1 %v1467_v45  ;;  %v1361_v45 = vpack.c.bf16 %v74_v40, %v71_v39  ;;  %v1495_v47 = vpack.c.bf16 %v184_v44, %v181_v43  ;;  %v653_v39 = vld [vmem:[%s1994_s3 + $0xb8] sm:$0xff]  ;;  %v1377_v40 = vpack.c.bf16 %v98_v33, %v95_v32  ;;  %v636_v44 = vld [vmem:[%s1994_s3 + $0x30] sm:$0xff]  ;;  %v116_v33 = vld [vmem:[#allocation4 + $0x228] sm:$0xff] }
  0x49   :  { %v113_v32 = vld [vmem:[#allocation4 + $0x210] sm:$0xff] }
  0x4a   :  { %1362 = vmatpush1.bf16.xpose.msra.mxu0 %v1361_v45  ;;  %v637_v45 = vld [vmem:[%s1994_s3 + $0x38] sm:$0xff] }
  0x4b   :  { %1364 = vmatprep.subr.bf16.mxu0 %v1363_v46  ;;  %v654_v46 = vld [vmem:[%s1994_s3 + $0xc0] sm:$0xff] }
  0x4f   :  { %1470 = vmatpush1.bf16.xpose.msra.mxu1 %v1469_v50  ;;  %v84_v50 = vld [vmem:[#allocation4 + $0x128] sm:$0xff] }
  0x50   :  { %1472 = vmatprep.subr.bf16.mxu1 %v1471_v51 }
  0x56   :  { %434 = vmatmul.mubr.f32.vlgmr.msra.gmra.mrb[0].mxu1 %v1706_v54 }
  0x57   :  { %1474 = vmatpush3.bf16.xpose.msra.mxu1 %v1471_v51  ;;  %438 = vmatprep.mubr.f32.mxu1 %v1711_v56  ;;  %v87_v51 = vld [vmem:[#allocation4 + $0x140] sm:$0xff] }
  0x58   :  { %1476 = vmatprep.subr.bf16.mxu1 %v1475_v55  ;;  %v1367_v59 = vpack.c.bf16 %v87_v51, %v84_v50  ;;  %v638_v51 = vld [vmem:[%s1994_s3 + $0x40] sm:$0xff] }
  0x5a   :  { %439 = vmatmul.mubr.f32.gmra.mrb[2].mxu1 %v1718_v57 }
  0x5b   :  { %443 = vmatprep.mubr.f32.mxu1 %v1723_v58 }
  0x5e   :  { %444 = vmatmul.mubr.f32.gmra.mrb[4].mxu1 %v1728_v61 }
  0x5f   :  { %1478 = vmatpush3.bf16.xpose.msra.mxu1 %v1475_v55  ;;  %448 = vmatprep.mubr.f32.mxu1 %v1735_v6  ;;  %v1365_v55 = vpack.c.bf16 %v80_v49, %v77_v48  ;;  %v101_v48 = vld [vmem:[#allocation4 + $0x1b0] sm:$0xff]  ;;  %v104_v49 = vld [vmem:[#allocation4 + $0x1c8] sm:$0xff] }
  0x60   :  { %1480 = vmatprep.subr.bf16.mxu1 %v1479_v5 }
  0x61   :  { %1366 = vmatpush1.bf16.xpose.msra.mxu0 %v1365_v55  ;;  %v657_v55 = vld [vmem:[%s1994_s3 + $0xd8] sm:$0xff] }
  0x62   :  { %449 = vmatmul.mubr.f32.gmra.mrb[6].mxu1 %v1742_v9  ;;  %1368 = vmatprep.subr.bf16.mxu0 %v1367_v59  ;;  %v1381_v59 = vpack.c.bf16 %v104_v49, %v101_v48  ;;  %v1523_v62 = vpack.c.bf16 %v657_v55, %v656_v53  ;;  %v126_v48 = vld [vmem:[#allocation4 + $0x278] sm:$0xff]  ;;  %v129_v49 = vld [vmem:[#allocation4 + $0x290] sm:$0xff]  ;;  %v670_v53 = vld [vmem:[%s1994_s3 + $0x140] sm:$0xff] }
  0x63   :  { %1291 = vmatprep.mubr.f32.mxu1 %v1747_v12  ;;  %v671_v55 = vld [vmem:[%s1994_s3 + $0x148] sm:$0xff] }
  0x67   :  { %1482 = vmatpush3.bf16.xpose.msra.mxu1 %v1479_v5  ;;  %v1371_v5 = vpack.c.bf16 %v93_v1, %v90_v0  ;;  %v641_v0 = vld [vmem:[%s1994_s3 + $0x58] sm:$0xff]  ;;  %v658_v1 = vld [vmem:[%s1994_s3 + $0xe0] sm:$0xff] }
  0x68   :  { %1484 = vmatprep.subr.bf16.mxu1 %v1483_v20  ;;  %v1525_v3 = vpack.c.bf16 %v641_v0, %v640_v63  ;;  %v132_v63 = vld [vmem:[#allocation4 + $0x2a8] sm:$0xff]  ;;  %v135_v0 = vld [vmem:[#allocation4 + $0x2c0] sm:$0xff] }
  0x69   :  { %1370 = vmatpush1.bf16.xpose.msra.mxu0 %v1369_v4  ;;  %v1527_v4 = vpack.c.bf16 %v659_v2, %v658_v1  ;;  %v672_v1 = vld [vmem:[%s1994_s3 + $0x150] sm:$0xff]  ;;  %v673_v2 = vld [vmem:[%s1994_s3 + $0x158] sm:$0xff] }
  0x6a   :  { %1372 = vmatprep.subr.bf16.mxu0 %v1371_v5  ;;  %v642_v5 = vld [vmem:[%s1994_s3 + $0x60] sm:$0xff] }
  0x6f   :  { %1486 = vmatpush3.bf16.xpose.msra.mxu1 %v1483_v20  ;;  %v1772_v20 = vld [vmem:[%s1991_s0 + $0x28] sm:$0xff] }
  0x70   :  { %1488 = vmatprep.subr.bf16.mxu1 %v1487_v29 }
  0x71   :  { %1374 = vmatpush1.bf16.xpose.msra.mxu0 %v1373_v19  ;;  %v114_v19 = vld [vmem:[#allocation4 + $0x218] sm:$0xff] }
  0x72   :  { %1376 = vmatprep.subr.bf16.mxu0 %v1375_v26  ;;  %v1385_v26 = vpack.c.bf16 %v110_v18, %v107_v14  ;;  %v138_v14 = vld [vmem:[#allocation4 + $0x2d8] sm:$0xff] }
  0x73   :  { %v677_v18 = vld [vmem:[%s1994_s3 + $0x178] sm:$0xff] }
  0x77   :  { %1490 = vmatpush3.bf16.xpose.msra.mxu1 %v1487_v29  ;;  %v1795_v29 = vld [vmem:[%s1991_s0 + $0x58] sm:$0xff] }
  0x78   :  { %1492 = vmatprep.subr.bf16.mxu1 %v1491_v38 }
  0x79   :  { %1378 = vmatpush1.bf16.xpose.msra.mxu0 %v1377_v40  ;;  %v1539_v40 = vpack.c.bf16 %v665_v36, %v664_v35 }
  0x7a   :  { %1380 = vmatprep.subr.bf16.mxu0 %v1379_v42  ;;  %v666_v42 = vld [vmem:[%s1994_s3 + $0x120] sm:$0xff] }
  0x7f   :  { %1494 = vmatpush3.bf16.xpose.msra.mxu1 %v1491_v38  ;;  %v652_v38 = vld [vmem:[%s1994_s3 + $0xb0] sm:$0xff] }
  0x80   :  { %1496 = vmatprep.subr.bf16.mxu1 %v1495_v47  ;;  %v1515_v43 = vpack.c.bf16 %v653_v39, %v652_v38  ;;  %v123_v38 = vld [vmem:[#allocation4 + $0x260] sm:$0xff]  ;;  %v1389_v39 = vpack.c.bf16 %v116_v33, %v113_v32  ;;  %v52_v32 = vld [vmem:[#allocation4 + $0x28] sm:$0xff] }
  0x81   :  { %1382 = vmatpush1.bf16.xpose.msra.mxu0 %v1381_v59  ;;  %v125_v59 = vld [vmem:[#allocation4 + $0x270] sm:$0xff]  ;;  %v103_v33 = vld [vmem:[#allocation4 + $0x1c0] sm:$0xff] }
  0x82   :  { %1384 = vmatprep.subr.bf16.mxu0 %v1383_v17  ;;  %v676_v17 = vld [vmem:[%s1994_s3 + $0x170] sm:$0xff] }
  0x87   :  { %1498 = vmatpush3.bf16.xpose.msra.mxu1 %v1495_v47  ;;  %v655_v47 = vld [vmem:[%s1994_s3 + $0xc8] sm:$0xff] }
  0x88   :  { %1500 = vmatprep.subr.bf16.mxu1 %v1499_v60  ;;  %v1519_v50 = vpack.c.bf16 %v655_v47, %v654_v46  ;;  %v668_v47 = vld [vmem:[%s1994_s3 + $0x130] sm:$0xff] }
  0x89   :  { %1386 = vmatpush1.bf16.xpose.msra.mxu0 %v1385_v26  ;;  %v97_v26 = vld [vmem:[#allocation4 + $0x190] sm:$0xff] }
  0x8f   :  { %1502 = vmatpush3.bf16.xpose.msra.mxu1 %v1499_v60  ;;  %v1521_v60 = vpack.c.bf16 %v639_v52, %v638_v51  ;;  %v1395_v52 = vpack.c.bf16 %v129_v49, %v126_v48  ;;  %v76_v48 = vld [vmem:[#allocation4 + $0xe8] sm:$0xff]  ;;  %v127_v49 = vld [vmem:[#allocation4 + $0x280] sm:$0xff] }
  0x90   :  { %1504 = vmatprep.subr.bf16.mxu1 %v1503_v7  ;;  %v643_v7 = vld [vmem:[%s1994_s3 + $0x68] sm:$0xff] }
  0x91   :  { %v1529_v16 = vpack.c.bf16 %v643_v7, %v642_v5  ;;  %v1555_v5 = vpack.c.bf16 %v673_v2, %v672_v1  ;;  %v674_v7 = vld [vmem:[%s1994_s3 + $0x160] sm:$0xff]  ;;  %v88_v1 = vld [vmem:[#allocation4 + $0x148] sm:$0xff] }
  0x92   :  { %v139_v2 = vld [vmem:[#allocation4 + $0x2e0] sm:$0xff] }
  0x96   :  { %1292 = vmatmul.mubr.f32.vlgmr.msra.gmra.mrb[8].mxu1 %v1772_v20 }
  0x97   :  { %1506 = vmatpush3.bf16.msra.mxu1 %v1505_v21  ;;  %1294 = vmatprep.mubr.f32.mxu1 %v1777_v22  ;;  %v117_v21 = vld [vmem:[#allocation4 + $0x230] sm:$0xff] }
  0x98   :  { %1508 = vmatprep.subr.bf16.mxu1 %v1507_v23  ;;  %v1531_v23 = vpack.c.bf16 %v661_v10, %v660_v8  ;;  %v1387_v27 = vpack.c.bf16 %v117_v21, %v114_v19  ;;  %v675_v8 = vld [vmem:[%s1994_s3 + $0x168] sm:$0xff]  ;;  %v131_v10 = vld [vmem:[#allocation4 + $0x2a0] sm:$0xff] }
  0x99   :  { %v1559_v13 = vpack.c.bf16 %v675_v8, %v674_v7  ;;  %v1401_v19 = vpack.c.bf16 %v134_v11, %v131_v10  ;;  %v91_v7 = vld [vmem:[#allocation4 + $0x160] sm:$0xff]  ;;  %v94_v8 = vld [vmem:[#allocation4 + $0x178] sm:$0xff] }
  0x9a   :  { %1295 = vmatmul.mubr.f32.gmra.mrb[10].mxu1 %v1795_v29  ;;  %1388 = vmatprep.subr.bf16.mxu0 %v1387_v27  ;;  %v100_v27 = vld [vmem:[#allocation4 + $0x1a8] sm:$0xff]  ;;  %v1437_v10 = vpack.c.bf16 %v94_v8, %v91_v7 }
  0x9b   :  { %1510 = vmatpush3.bf16.msra.mxu1 %v1509_v30  ;;  %742 = vmatprep.mubr.f32.mxu1 %v1699_v15  ;;  %v1517_v15 = vpack.c.bf16 %v637_v45, %v636_v44  ;;  %v663_v30 = vld [vmem:[%s1994_s3 + $0x108] sm:$0xff]  ;;  %v119_v44 = vld [vmem:[#allocation4 + $0x240] sm:$0xff]  ;;  %v122_v45 = vld [vmem:[#allocation4 + $0x258] sm:$0xff] }
  0x9c   :  { %1512 = vmatprep.subr.bf16.mxu1 %v1511_v34  ;;  %v1535_v34 = vpack.c.bf16 %v663_v30, %v662_v28  ;;  %1390 = vmatpush1.bf16.xpose.msra.mxu0 %v1389_v39  ;;  %v1405_v28 = vpack.c.bf16 %v140_v25, %v137_v24  ;;  %v1407_v30 = vpack.c.bf16 %v100_v27, %v97_v26 }
  0x9f   :  { %1514 = vmatpush3.bf16.msra.mxu1 %v1513_v41  ;;  %v1391_v41 = vpack.c.bf16 %v123_v38, %v120_v37  ;;  %v55_v37 = vld [vmem:[#allocation4 + $0x40] sm:$0xff]  ;;  %v58_v38 = vld [vmem:[#allocation4 + $0x58] sm:$0xff] }
  0xa0   :  { %1516 = vmatprep.subr.bf16.mxu1 %v1515_v43  ;;  %v667_v43 = vld [vmem:[%s1994_s3 + $0x128] sm:$0xff]  ;;  %v1413_v39 = vpack.c.bf16 %v58_v38, %v55_v37 }
  0xa1   :  { %v1543_v46 = vpack.c.bf16 %v667_v43, %v666_v42  ;;  %1392 = vmatprep.subr.bf16.mxu0 %v1391_v41  ;;  %v61_v41 = vld [vmem:[#allocation4 + $0x70] sm:$0xff]  ;;  %v64_v42 = vld [vmem:[#allocation4 + $0x88] sm:$0xff] }
  0xa2   :  { %v1417_v43 = vpack.c.bf16 %v64_v42, %v61_v41 }
  0xa3   :  { %1518 = vmatpush3.bf16.msra.mxu1 %v1517_v15  ;;  %v669_v15 = vld [vmem:[%s1994_s3 + $0x138] sm:$0xff] }
  0xa4   :  { %1520 = vmatprep.subr.bf16.mxu1 %v1519_v50  ;;  %v1393_v50 = vpack.c.bf16 %v122_v45, %v119_v44  ;;  %v1547_v51 = vpack.c.bf16 %v669_v15, %v668_v47  ;;  %v115_v44 = vld [vmem:[#allocation4 + $0x220] sm:$0xff]  ;;  %v73_v15 = vld [vmem:[#allocation4 + $0xd0] sm:$0xff] }
  0xa6   :  { %1394 = vmatpush1.bf16.xpose.msra.mxu0 %v1393_v50  ;;  %v130_v50 = vld [vmem:[#allocation4 + $0x298] sm:$0xff] }
  0xa7   :  { %1522 = vmatpush3.bf16.msra.mxu1 %v1521_v60  ;;  %v128_v60 = vld [vmem:[#allocation4 + $0x288] sm:$0xff]  ;;  %1396 = vmatprep.subr.bf16.mxu0 %v1395_v52  ;;  %v1427_v52 = vpack.c.bf16 %v130_v50, %v127_v49 }
  0xa8   :  { %1524 = vmatprep.subr.bf16.mxu1 %v1523_v62  ;;  %v1551_v62 = vpack.c.bf16 %v671_v55, %v670_v53  ;;  %v79_v53 = vld [vmem:[#allocation4 + $0x100] sm:$0xff]  ;;  %v82_v55 = vld [vmem:[#allocation4 + $0x118] sm:$0xff] }
  0xab   :  { %1526 = vmatpush3.bf16.msra.mxu1 %v1525_v3  ;;  %v1397_v3 = vpack.c.bf16 %v128_v60, %v125_v59  ;;  %v1429_v59 = vpack.c.bf16 %v82_v55, %v79_v53  ;;  %v133_v60 = vld [vmem:[#allocation4 + $0x2b0] sm:$0xff] }
  0xac   :  { %1528 = vmatprep.subr.bf16.mxu1 %v1527_v4  ;;  %v1399_v4 = vpack.c.bf16 %v135_v0, %v132_v63  ;;  %v85_v63 = vld [vmem:[#allocation4 + $0x130] sm:$0xff] }
  0xae   :  { %1398 = vmatpush1.bf16.xpose.msra.mxu0 %v1397_v3  ;;  %v142_v3 = vld [vmem:[#allocation4 + $0x2f8] sm:$0xff] }
  0xaf   :  { %1530 = vmatpush3.bf16.msra.mxu1 %v1529_v16  ;;  %1400 = vmatprep.subr.bf16.mxu0 %v1399_v4  ;;  %v141_v16 = vld [vmem:[#allocation4 + $0x2f0] sm:$0xff]  ;;  %v1433_v4 = vpack.c.bf16 %v88_v1, %v85_v63 }
  0xb0   :  { %1532 = vmatprep.subr.bf16.mxu1 %v1531_v23  ;;  %v1403_v21 = vpack.c.bf16 %v141_v16, %v138_v14  ;;  %v1563_v23 = vpack.c.bf16 %v677_v18, %v676_v17 }
  0xb3   :  { %1534 = vmatpush3.bf16.msra.mxu1 %v1533_v31  ;;  %v49_v31 = vld [vmem:[#allocation4 + $0x10] sm:$0xff] }
  0xb4   :  { %1536 = vmatprep.subr.bf16.mxu1 %v1535_v34  ;;  %v1409_v35 = vpack.c.bf16 %v52_v32, %v49_v31 }
  0xb6   :  { %743 = vmatmul.mubr.f32.vlgmr.msra.gmra.mrb[12].mxu1 %v1706_v54  ;;  %1402 = vmatpush1.bf16.xpose.msra.mxu0 %v1401_v19 }
  0xb7   :  { %1538 = vmatpush3.bf16.msra.mxu1 %v1535_v34  ;;  %747 = vmatprep.mubr.f32.mxu1 %v1711_v56  ;;  %v106_v34 = vld [vmem:[#allocation4 + $0x1d8] sm:$0xff] }
  0xb8   :  { %1540 = vmatprep.subr.bf16.mxu1 %v1539_v40  ;;  %1404 = vmatprep.subr.bf16.mxu0 %v1403_v21  ;;  %v1411_v36 = vpack.c.bf16 %v106_v34, %v103_v33  ;;  %v881_v21 = vld [vmem:[%s1995_s4 + $0x10] sm:$0xff] }
  0xba   :  { %748 = vmatmul.mubr.f32.gmra.mrb[14].mxu1 %v1718_v57 }
  0xbb   :  { %1542 = vmatpush3.bf16.msra.mxu1 %v1539_v40  ;;  %752 = vmatprep.mubr.f32.mxu1 %v1723_v58  ;;  %v112_v40 = vld [vmem:[#allocation4 + $0x208] sm:$0xff] }
  0xbc   :  { %1544 = vmatprep.subr.bf16.mxu1 %v1543_v46 }
  0xbe   :  { %753 = vmatmul.mubr.f32.gmra.mrb[16].mxu1 %v1728_v61  ;;  %1406 = vmatpush1.bf16.xpose.msra.mxu0 %v1405_v28 }
  0xbf   :  { %1546 = vmatpush3.bf16.msra.mxu1 %v1543_v46  ;;  %757 = vmatprep.mubr.f32.mxu1 %v1735_v6  ;;  %v121_v46 = vld [vmem:[#allocation4 + $0x250] sm:$0xff] }
  0xc0   :  { %1548 = vmatprep.subr.bf16.mxu1 %v1547_v51  ;;  %1408 = vmatprep.subr.bf16.mxu0 %v1407_v30 }
  0xc2   :  { %758 = vmatmul.mubr.f32.gmra.mrb[18].mxu1 %v1742_v9 }
  0xc3   :  { %1550 = vmatpush3.bf16.msra.mxu1 %v1547_v51  ;;  %1329 = vmatprep.mubr.f32.mxu1 %v1747_v12  ;;  %v1425_v51 = vpack.c.bf16 %v76_v48, %v73_v15 }
  0xc4   :  { %1552 = vmatprep.subr.bf16.mxu1 %v1551_v62 }
  0xc5   :  { %256 = vmatmul.mubr.f32.vlgmr.msra.gmra.mrb[0].mxu0 %v1706_v54  ;;  %v109_v54 = vld [vmem:[#allocation4 + $0x1f0] sm:$0xff] }
  0xc6   :  { %1410 = vmatpush3.bf16.xpose.msra.mxu0 %v1409_v35  ;;  %261 = vmatprep.mubr.f32.mxu0 %v1711_v56  ;;  %v1415_v56 = vpack.c.bf16 %v112_v40, %v109_v54 }
  0xc7   :  { %1554 = vmatpush3.bf16.msra.mxu1 %v1551_v62  ;;  %1412 = vmatprep.subr.bf16.mxu0 %v1411_v36  ;;  %v136_v62 = vld [vmem:[#allocation4 + $0x2c8] sm:$0xff] }
  0xc8   :  { %1556 = vmatprep.subr.bf16.mxu1 %v1555_v5  ;;  %v1431_v0 = vpack.c.bf16 %v136_v62, %v133_v60  ;;  %v543_v60 = vld [vmem:[%s1993_s2] sm:$0x7]  ;;  %s1650_s2 = smov [#allocation7]  }
  0xc9   :  { %262 = vmatmul.mubr.f32.gmra.mrb[2].mxu0 %v1718_v57  ;;  %v118_v57 = vld [vmem:[#allocation4 + $0x238] sm:$0xff]  ;;  %s1110_s8 = sshll.u32 %s1650_s2, 4  ;;  %s1111_s8 = int_to_ptr.vmem [resolvable:$true] %s1110_s8 }
  0xca   :  { %267 = vmatprep.mubr.f32.mxu0 %v1723_v58  ;;  %v1419_v45 = vpack.c.bf16 %v118_v57, %v115_v44  ;;  %v67_v58 = vld [vmem:[#allocation4 + $0xa0] sm:$0xff]  ;;  %s1620_s9 = scalar_lea.vmem %s1111_s8, 1536  ;;  %p1625_p9 = scmp.lt.s32.totalorder %s1111_s8, %s1111_s8 }
  0xcb   :  { %1558 = vmatpush3.bf16.msra.mxu1 %v1555_v5  ;;  %v1435_v5 = vpack.c.bf16 %v142_v3, %v139_v2  ;;  %p1621_p8 = scmp.ne.s32.totalorder %s1111_s8, %s1620_s9  ;;  %p1626_p10 = scmp.lt.s32.totalorder %s1620_s9, %s1620_s9 }
  0xcc   :  { %1560 = vmatprep.subr.bf16.mxu1 %v1559_v13 }
  0xcd   :  { %268 = vmatmul.mubr.f32.gmra.mrb[4].mxu0 %v1728_v61  ;;  %v70_v61 = vld [vmem:[#allocation4 + $0xb8] sm:$0xff]  ;;  %p1627_p11 = por %p1626_p10, %p1625_p9 }
  0xce   :  { %1414 = vmatpush3.bf16.xpose.msra.mxu0 %v1413_v39  ;;  %273 = vmatprep.mubr.f32.mxu0 %v1735_v6  ;;  %v124_v6 = vld [vmem:[#allocation4 + $0x268] sm:$0xff]  ;;  %v1421_v47 = vpack.c.bf16 %v70_v61, %v67_v58 }
  0xcf   :  { %1562 = vmatpush3.bf16.msra.mxu1 %v1559_v13  ;;  %1416 = vmatprep.subr.bf16.mxu0 %v1415_v56  ;;  %p1628_p12 = pnand %p1627_p11, %p1621_p8 }
  0xd0   :  { %1564 = vmatprep.subr.bf16.mxu1 %v1563_v23 }
  0xd1   :  { %274 = vmatmul.mubr.f32.gmra.mrb[6].mxu0 %v1742_v9  ;;  %v1423_v9 = vpack.c.bf16 %v124_v6, %v121_v46 }
  0xd2   :  { %1162 = vmatprep.mubr.f32.mxu0 %v1747_v12 }
  0xd3   :  { %1566 = vmatpush3.bf16.msra.mxu1 %v1563_v23 }
  0xd6   :  { %1330 = vmatmul.mubr.f32.vlgmr.msra.gmra.mrb[20].mxu1 %v1772_v20  ;;  %1418 = vmatpush3.bf16.xpose.msra.mxu0 %v1417_v43 }
  0xd7   :  { %1332 = vmatprep.mubr.f32.mxu1 %v1777_v22  ;;  %1420 = vmatprep.subr.bf16.mxu0 %v1419_v45 }
  0xda   :  { %1333 = vmatmul.mubr.f32.gmra.mrb[22].mxu1 %v1795_v29 }
  0xde   :  { %1422 = vmatpush3.bf16.xpose.msra.mxu0 %v1421_v47 }
  0xdf   :  { %1424 = vmatprep.subr.bf16.mxu0 %v1423_v9 }
  0xe6   :  { %1426 = vmatpush3.bf16.xpose.msra.mxu0 %v1425_v51 }
  0xe7   :  { %1428 = vmatprep.subr.bf16.mxu0 %v1427_v52  ;;  %v545_v52 = vlaneseq }
  0xe9   :  { %v546_v53 = vshrl.u32 %v545_v52, 7 }
  0xeb   :  { %v547_v55 = vsub.s32 0, %v546_v53 }
  0xed   :  { %v548_v62 = vrot.slane %v543_v60, %v547_v55 }
  0xee   :  { %1430 = vmatpush3.bf16.xpose.msra.mxu0 %v1429_v59  ;;  %v551_v59 = vsub.s32 1, %v546_v53 }
  0xef   :  { %1432 = vmatprep.subr.bf16.mxu0 %v1431_v0 }
  0xf0   :  { %v552_v63 = vrot.slane %v543_v60, %v551_v59 }
  0xf6   :  { %1434 = vmatpush3.bf16.xpose.msra.mxu0 %v1433_v4 }
  0xf7   :  { %1436 = vmatprep.subr.bf16.mxu0 %v1435_v5  ;;  %v555_v5 = vsub.s32 2, %v546_v53 }
  0xfe   :  { %1438 = vmatpush3.bf16.xpose.msra.mxu0 %v1437_v10 }
 0x105   :  { %1163 = vmatmul.mubr.f32.vlgmr.msra.gmra.mrb[0].mxu0 %v1747_v12  ;;  %v880_v12 = vld [vmem:[%s1995_s4 + $0x8] sm:$0xff] }
 0x106   :  { %1164 = vmatprep.mubr.f32.mxu0 %v1772_v20  ;;  %895 = vmatprep.subr.mxu0 %v880_v12 }
 0x107   :  { %1567 = vmatprep.subr.mxu1 %v880_v12 }
 0x109   :  { %1165 = vmatmul.mubr.f32.gmra.mrb[2].mxu0 %v1772_v20  ;;  %v879_v20 = vld [vmem:[%s1995_s4] sm:$0xff] }
 0x10a   :  { %1166 = vmatprep.mubr.f32.mxu0 %v1777_v22  ;;  %896 = vmatpush1.msra.mxu0 %v879_v20 }
 0x10b   :  { %1568 = vmatpush1.msra.mxu1 %v879_v20 }
 0x10c   :  { %1335 = vmatprep.subr.mxu1 %v881_v21 }
 0x10d   :  { %1167 = vmatmul.mubr.f32.gmra.mrb[4].mxu0 %v1777_v22  ;;  %v1649_v22 = vmov 0.0  }
 0x10e   :  { %1168 = vmatprep.mubr.f32.mxu0 %v1795_v29  ;;  %971 = vmatprep.mubr.f32.mxu1 %v1649_v22 }
 0x111   :  { %1169 = vmatmul.mubr.f32.gmra.mrb[6].mxu0 %v1795_v29 }
 0x112   :  { %959 = vmatprep.mubr.f32.mxu0 %v1649_v22 }
 0x129   :  { %v435_v11 = vpop.f32.mrb[0].mxu1 }
 0x12a   :  { %v437_v13 = vpop.f32.mrb[1].mxu1 }
 0x12d   :  { %v440_v14 = vpop.f32.mrb[2].mxu1 }
 0x12e   :  { %v442_v16 = vpop.f32.mrb[3].mxu1 }
 0x131   :  { %v445_v17 = vpop.f32.mrb[4].mxu1 }
 0x132   :  { %v447_v18 = vpop.f32.mrb[5].mxu1 }
 0x133   :  { %v556_v18 = vrot.slane %v543_v60, %v555_v5 }
 0x135   :  { %v450_v29 = vpop.f32.mrb[6].mxu1 }
 0x136   :  { %v452_v19 = vpop.f32.mrb[7].mxu1 }
 0x169   :  { %v1293_v23 = vpop.f32.mrb[8].mxu1 }
 0x16a   :  { %v1949_v24 = vadd.f32 %v1293_v23, %v440_v14  ;;  %v520_v25 = vpop.f32.mrb[9].mxu1 }
 0x16b   :  { %v1951_v26 = vadd.f32 %v520_v25, %v435_v11 }
 0x16c   :  { %v565_v25 = vadd.f32 %v556_v18, %v1949_v24 }
 0x16d   :  { %v1296_v27 = vpop.f32.mrb[10].mxu1 }
 0x16e   :  { %v1953_v28 = vadd.f32 %v1296_v27, %v450_v29  ;;  %v530_v30 = vpop.f32.mrb[11].mxu1 }
 0x16f   :  { %v1955_v31 = vadd.f32 %v530_v30, %v445_v17  ;;  %v562_v30 = vadd.f32 %v556_v18, %v1951_v26 }
 0x189   :  { %v1222_v32 = vpop.f32.mrb[12].mxu1 }
 0x18a   :  { %v1223_v33 = vpop.f32.mrb[13].mxu1 }
 0x18b   :  { %v1224_v34 = vadd.f32 %v1223_v33, %v1222_v32 }
 0x18d   :  { %v1225_v35 = vpop.f32.mrb[14].mxu1 }
 0x18e   :  { %v1226_v36 = vpop.f32.mrb[15].mxu1 }
 0x18f   :  { %v1227_v37 = vadd.f32 %v1226_v36, %v1225_v35  ;;  %v571_v35 = vadd.f32 %v556_v18, %v1953_v28 }
 0x191   :  { %v1228_v38 = vpop.f32.mrb[16].mxu1 }
 0x192   :  { %v1229_v39 = vpop.f32.mrb[17].mxu1 }
 0x193   :  { %v1230_v54 = vadd.f32 %v1229_v39, %v1228_v38 }
 0x195   :  { %v1231_v40 = vpop.f32.mrb[18].mxu1 }
 0x196   :  { %v1232_v56 = vpop.f32.mrb[19].mxu1 }
 0x197   :  { %v1233_v41 = vadd.f32 %v1232_v56, %v1231_v40 }
 0x1a9   :  { %v1331_v42 = vpop.f32.mrb[20].mxu1 }
 0x1aa   :  { %v835_v43 = vadd.f32 %v1331_v42, %v1227_v37  ;;  %v829_v44 = vpop.f32.mrb[21].mxu1  ;;  %v568_v37 = vadd.f32 %v556_v18, %v1955_v31 }
 0x1ab   :  { %v830_v57 = vadd.f32 %v1224_v34, %v829_v44 }
 0x1ac   :  { %853 = vst.msk [vmem:[#allocation3 + $0x8] sm:$0xff] %vm851_vm0, %v835_v43 }
 0x1ad   :  { %852 = vst.msk [vmem:[#allocation3] sm:$0xff] %vm851_vm0, %v830_v57  ;;  %v1334_v45 = vpop.f32.mrb[22].mxu1 }
 0x1ae   :  { %v845_v58 = vadd.f32 %v1334_v45, %v1233_v41  ;;  %v839_v61 = vpop.f32.mrb[23].mxu1 }
 0x1af   :  { %v840_v46 = vadd.f32 %v1230_v54, %v839_v61 }
 0x1b0   :  { %855 = vst.msk [vmem:[#allocation3 + $0x18] sm:$0xff] %vm851_vm0, %v845_v58 }
 0x1b1   :  { %854 = vst.msk [vmem:[#allocation3 + $0x10] sm:$0xff] %vm851_vm0, %v840_v46 }
 0x1b3   :  { %v876_v47 = vld [vmem:[#allocation3 + $0x8] sm:$0xff] }
 0x1b4   :  { %v875_v6 = vld [vmem:[#allocation3] sm:$0xff] }
 0x1b5   :  { %1122 = vmatmul.mubr.msk.f32.vlgmr.msra.gmra.mrb[0].mxu0 %vm851_vm0, %v875_v6 }
 0x1b6   :  { %965 = vmatprep.mubr.f32.mxu0 %v1649_v22 }
 0x1b7   :  { %v878_v15 = vld [vmem:[#allocation3 + $0x18] sm:$0xff] }
 0x1b8   :  { %v877_v9 = vld [vmem:[#allocation3 + $0x10] sm:$0xff] }
 0x1b9   :  { %1123 = vmatmul.mubr.msk.f32.gmra.mrb[2].mxu0 %vm851_vm0, %v876_v47  ;;  %1124 = vmatmul.mubr.msk.f32.vlgmr.msra.gmra.mrb[24].mxu1 %vm851_vm0, %v877_v9 }
 0x1ba   :  { %1336 = vmatpush3.msra.mxu1 %v881_v21  ;;  %977 = vmatprep.mubr.f32.mxu1 %v1649_v22 }
 0x1bd   :  { %1125 = vmatmul.mubr.msk.f32.gmra.mrb[26].mxu1 %vm851_vm0, %v878_v15 }
 0x1be   :  { %1337 = vmatprep.mubr.msk.f32.mxu1 %vm851_vm0, %v875_v6 }
 0x1c1   :  { %1338 = vmatmul.mubr.msk.f32.vlgmr.msra.gmra.mrb[28].mxu1 %vm851_vm0, %v876_v47 }
 0x1c2   :  { %1340 = vmatprep.mubr.msk.f32.mxu1 %vm851_vm0, %v877_v9 }
 0x1c5   :  { %1341 = vmatmul.mubr.msk.f32.gmra.mrb[30].mxu1 %vm851_vm0, %v878_v15 }
 0x1e0   :  { %v358_v48 = vpop.f32.mrb[4].mxu0 }
 0x1e1   :  { %v360_v49 = vpop.f32.mrb[5].mxu0  ;;  %v1573_v4 = vadd.f32 %v548_v62, %v358_v48 }
 0x1e2   :  { %v1575_v7 = vadd.f32 %v552_v63, %v360_v49 }
 0x1e4   :  { %v364_v50 = vpop.f32.mrb[6].mxu0 }
 0x1e5   :  { %v366_v51 = vpop.f32.mrb[7].mxu0  ;;  %v1577_v20 = vadd.f32 %v548_v62, %v364_v50 }
 0x1e6   :  { %v1579_v22 = vadd.f32 %v552_v63, %v366_v51 }
 0x288   :  { %v961_v0 = vpop.f32.mrb[0].mxu0 }
 0x289   :  { %v1569_v1 = vadd.f32 %v961_v0, %v548_v62  ;;  %v963_v2 = vpop.f32.mrb[1].mxu0 }
 0x28a   :  { %v1570_v3 = vadd.f32 %v963_v2, %v552_v63 }
 0x28b   :  { %1093 = vst [vmem:[#allocation7] sm:$0xff] %v1569_v1 }
 0x28c   :  { %1094 = vst [vmem:[#allocation7 + $0x8] sm:$0xff] %v1570_v3  ;;  %v967_v8 = vpop.f32.mrb[2].mxu0  ;;  %v973_v10 = vpop.f32.mrb[24].mxu1 }
 0x28d   :  { %v1571_v11 = vadd.f32 %v967_v8, %v548_v62  ;;  %v1574_v13 = vadd.f32 %v1573_v4, %v973_v10  ;;  %v969_v14 = vpop.f32.mrb[3].mxu0  ;;  %v975_v16 = vpop.f32.mrb[25].mxu1 }
 0x28e   :  { %v1572_v17 = vadd.f32 %v969_v14, %v552_v63  ;;  %v1576_v12 = vadd.f32 %v1575_v7, %v975_v16 }
 0x28f   :  { %1096 = vst [vmem:[#allocation7 + $0x18] sm:$0xff] %v1571_v11  ;;  %1099 = vst [vmem:[#allocation7 + $0x30] sm:$0xff] %v1574_v13 }
 0x290   :  { %1097 = vst [vmem:[#allocation7 + $0x20] sm:$0xff] %v1572_v17  ;;  %1100 = vst [vmem:[#allocation7 + $0x38] sm:$0xff] %v1576_v12  ;;  %v979_v29 = vpop.f32.mrb[26].mxu1 }
 0x291   :  { %v1578_v19 = vadd.f32 %v1577_v20, %v979_v29  ;;  %v981_v21 = vpop.f32.mrb[27].mxu1 }
 0x292   :  { %v1580_v23 = vadd.f32 %v1579_v22, %v981_v21 }
 0x293   :  { %1102 = vst [vmem:[#allocation7 + $0x48] sm:$0xff] %v1578_v19 }
 0x294   :  { %1103 = vst [vmem:[#allocation7 + $0x50] sm:$0xff] %v1580_v23  ;;  %v1339_v27 = vpop.f32.mrb[28].mxu1 }
 0x295   :  { %v1086_v32 = vadd.f32 %v1339_v27, %v565_v25  ;;  %v1050_v33 = vpop.f32.mrb[29].mxu1 }
 0x296   :  { %v1083_v34 = vadd.f32 %v1050_v33, %v562_v30 }
 0x297   :  { %1098 = vst [vmem:[#allocation7 + $0x28] sm:$0xff] %v1086_v32 }
 0x298   :  { %1095 = vst [vmem:[#allocation7 + $0x10] sm:$0xff] %v1083_v34  ;;  %v1342_v36 = vpop.f32.mrb[30].mxu1 }
 0x299   :  { %v1092_v38 = vadd.f32 %v1342_v36, %v571_v35  ;;  %v1060_v39 = vpop.f32.mrb[31].mxu1 }
 0x29a   :  { %v1089_v54 = vadd.f32 %v1060_v39, %v568_v37 }
 0x29b   :  { %1104 = vst [vmem:[#allocation7 + $0x58] sm:$0xff] %v1092_v38 }
 0x29c   :  { %1101 = vst [vmem:[#allocation7 + $0x40] sm:$0xff] %v1089_v54 }
 0x29d   :  { %1631 = shalt.err (!%p1628_p12)
}
 0x29e   :  { %s1632_s12 = scalar_lea.hbm %s1996_s5, 1536 }
 0x29f   :  { %p1633_p13 = scmp.ne.s32.totalorder %s1996_s5, %s1632_s12  ;;  %p1636_p0 = scmp.lt.u32.totalorder %s1632_s12, %s1996_s5 }
 0x2a1   :  { %p1638_p1 = pnand %p1636_p0, %p1633_p13 }
 0x2a3   :  { %1641 = shalt.err (!%p1638_p1)
}
 0x2a4   :  { %1116 = dma.vmem_to_hbm [thread:$0]  %s1111_s8, 1536, %s1996_s5, [#allocation6], %s1647_s28, %s1647_s28, %s1648_s29  }
 0x2a5   :  { %1644 = dma.done.wait [#allocation6], 1536  }
 0x2a6   :  { %1645 = vsyncadd [#allocation6], 4294965760 }
 0x2a7   :  { %1120 = vsyncpa [#allocation5], 1 }
 0x2a8   :  { %1121 = vsyncpa [#allocation6], 1 }

</bundles_post_ra>
